<compile_context>
chip_gen: v5e
topology: v5e:2x2
jax: 0.10.0
libtpu: 0.0.40
codegen_flags: <defaults>
</compile_context>

<pallas_src>
import jax
import jax.numpy as jnp
from jax.experimental import pallas as pl
from jax.experimental.pallas import tpu as pltpu

HID = 128        # hidden width of affine1
OUT_LANES = 8    # lane width of the fused head output slab (probs: 0-1, value: 2)


def _round_up(v, m):
    return ((v + m - 1) // m) * m


def policy_kernel(x_ref, w1_ref, b1_ref, wh_ref, bh_ref, out_ref):
    # ---- Layer 1 on the MXU: (bb,4) @ (4,128). K=4 pads to 8 inside the MXU for
    #      free and lands in the otherwise-idle vmatmul slot.
    h = jnp.dot(x_ref[...], w1_ref[...], preferred_element_type=jnp.float32) + b1_ref[...]
    h = jnp.maximum(h, 0.0)

    # ---- Fused heads: one MXU push producing the 8-lane slab.
    #      Lanes 0,1 = action logits, lane 2 = state value, lanes 3..7 = zero pad.
    head = jnp.dot(h, wh_ref[...], preferred_element_type=jnp.float32) + bh_ref[...]

    # ---- 2-way softmax as sigmoid-of-difference (exact, VPU+EUP, no XLU reduce).
    l0 = head[:, 0:1]
    l1 = head[:, 1:2]
    p0 = jax.nn.sigmoid(l0 - l1)          # == softmax([l0, l1])[0]
    p1 = jax.nn.sigmoid(l1 - l0)          # == softmax([l0, l1])[1]

    # ---- Direct stores: slab first (value already in lane 2), then overwrite the
    #      two prob lanes. Two single-lane stores beat iota + nested selects.
    out_ref[...] = head
    out_ref[:, 0:1] = p0
    out_ref[:, 1:2] = p1


def policy_forward(x, w1, b1, w2, b2, w3, b3, *, block_b=4096):
    """Returns (action_prob (B,2), state_values (B,1)) matching Policy.forward."""
    B, kin = x.shape

    # Fuse the two head weights/biases into one 8-lane slab (built once outside the
    # kernel; XLA constant-folds this under jit).
    wh = jnp.concatenate(
        [w2, w3, jnp.zeros((HID, OUT_LANES - 3), jnp.float32)], axis=1)   # (128, 8)
    bh = jnp.concatenate(
        [b2, b3, jnp.zeros((1, OUT_LANES - 3), jnp.float32)], axis=1)     # (1, 8)

    # ---- Batch tiling -------------------------------------------------------
    # Tile is a multiple of 8 sublanes, capped at block_b. For large batches cap
    # it further so the grid has >= 2 steps (v7x megacore: the "parallel" axis
    # shards across both TensorCores).
    bb = min(block_b, _round_up(B, 8))
    if B >= 2048:
        bb = min(bb, max(8, (B // 2) // 8 * 8))

    # Pad the batch up to a multiple of bb instead of collapsing to one giant
    # block (the old fallback blew VMEM for large non-divisible B).
    n_steps = pl.cdiv(B, bb)
    b_pad = n_steps * bb
    if b_pad != B:
        x = jnp.pad(x, ((0, b_pad - B), (0, 0)))

    out = pl.pallas_call(
        policy_kernel,
        out_shape=jax.ShapeDtypeStruct((b_pad, OUT_LANES), jnp.float32),
        grid=(n_steps,),
        in_specs=[
            pl.BlockSpec((bb, kin), lambda i: (i, 0)),          # x: stream over batch
            pl.BlockSpec((kin, HID), lambda i: (0, 0)),         # w1: VMEM-resident
            pl.BlockSpec((1, HID), lambda i: (0, 0)),           # b1: resident
            pl.BlockSpec((HID, OUT_LANES), lambda i: (0, 0)),   # fused head weight
            pl.BlockSpec((1, OUT_LANES), lambda i: (0, 0)),     # fused head bias
        ],
        out_specs=pl.BlockSpec((bb, OUT_LANES), lambda i: (i, 0)),
        compiler_params=pltpu.CompilerParams(
            dimension_semantics=("parallel",)),
    )(x, w1, b1, wh, bh)

    # Slice the narrow slab into the module's two outputs (drop batch padding).
    probs = out[:B, 0:2]
    value = out[:B, 2:3]
    return probs, value


def init_params(key):
    """Deterministic parameter init matching the shapes of Policy.__init__."""
    k1, k2, k3, k4, k5, k6 = jax.random.split(key, 6)
    # affine1: Linear(4, 128)     -> stored transposed as (4, 128)
    w1 = jax.random.uniform(k1, (4, HID), jnp.float32, -0.5, 0.5)
    b1 = jax.random.uniform(k2, (1, HID), jnp.float32, -0.5, 0.5)
    # action_head: Linear(128, 2) -> stored as (128, 2)
    w2 = jax.random.uniform(k3, (HID, 2), jnp.float32, -0.0884, 0.0884)
    b2 = jax.random.uniform(k4, (1, 2), jnp.float32, -0.0884, 0.0884)
    # value_head: Linear(128, 1)  -> stored as (128, 1)
    w3 = jax.random.uniform(k5, (HID, 1), jnp.float32, -0.0884, 0.0884)
    b3 = jax.random.uniform(k6, (1, 1), jnp.float32, -0.0884, 0.0884)
    return w1, b1, w2, b2, w3, b3


def policy_reference(x, w1, b1, w2, b2, w3, b3):
    h = jnp.maximum(x @ w1 + b1, 0.0)
    probs = jax.nn.softmax(h @ w2 + b2, axis=-1)
    value = h @ w3 + b3
    return probs, value


if __name__ == "__main__":
    key = jax.random.PRNGKey(0)
    kx, kp = jax.random.split(key)
    params = init_params(kp)

    # Primary small case: batch of 8 CartPole observations (4 features each).
    B = 8
    x = jax.random.normal(kx, (B, 4), jnp.float32)
    probs, value = policy_forward(x, *params)
    jax.block_until_ready((probs, value))

    probs_ref, value_ref = policy_reference(x, *params)
    assert probs.shape == (B, 2) and value.shape == (B, 1)
    assert jnp.allclose(probs, probs_ref, atol=1e-5, rtol=1e-5)
    assert jnp.allclose(value, value_ref, atol=1e-5, rtol=1e-5)
    assert jnp.allclose(jnp.sum(probs, axis=-1), 1.0, atol=1e-5)

    # Secondary small case with a batch NOT a multiple of 8, to exercise the
    # pad-to-tile path that replaced the old single-giant-block fallback.
    B2 = 20
    x2 = jax.random.normal(jax.random.PRNGKey(3), (B2, 4), jnp.float32)
    probs2, value2 = policy_forward(x2, *params)
    jax.block_until_ready((probs2, value2))
    probs2_ref, value2_ref = policy_reference(x2, *params)
    assert probs2.shape == (B2, 2) and value2.shape == (B2, 1)
    assert jnp.allclose(probs2, probs2_ref, atol=1e-5, rtol=1e-5)
    assert jnp.allclose(value2, value2_ref, atol=1e-5, rtol=1e-5)

    print("KERNEL_OK")
</pallas_src>

<mosaic_0001>
module attributes {stable_mosaic.version = 11 : i64} {
  func.func @policy_kernel(%arg0: i32, %arg1: memref<8x4xf32, #tpu.memory_space<vmem>>, %arg2: memref<4x128xf32, #tpu.memory_space<vmem>>, %arg3: memref<1x128xf32, #tpu.memory_space<vmem>>, %arg4: memref<128x8xf32, #tpu.memory_space<vmem>>, %arg5: memref<1x8xf32, #tpu.memory_space<vmem>>, %arg6: memref<8x8xf32, #tpu.memory_space<vmem>>) attributes {dimension_semantics = [#tpu.dimension_semantics<parallel>], iteration_bounds = array<i64: 1>, scalar_prefetch = 0 : i64, scratch_operands = 0 : i64, tpu.core_type = #tpu.core_type<tc>, window_params = [{transform_indices = @transform_0, window_bounds = array<i64: 8, 4>}, {pipeline_mode = #tpu.pipeline_mode<synchronous>, transform_indices = @transform_1, window_bounds = array<i64: 4, 128>}, {pipeline_mode = #tpu.pipeline_mode<synchronous>, transform_indices = @transform_2, window_bounds = array<i64: 1, 128>}, {pipeline_mode = #tpu.pipeline_mode<synchronous>, transform_indices = @transform_3, window_bounds = array<i64: 128, 8>}, {pipeline_mode = #tpu.pipeline_mode<synchronous>, transform_indices = @transform_4, window_bounds = array<i64: 1, 8>}, {transform_indices = @transform_5, window_bounds = array<i64: 8, 8>}]} {
    %c0 = arith.constant 0 : index
    %c0_0 = arith.constant 0 : index
    %0 = vector.load %arg1[%c0, %c0_0] : memref<8x4xf32, #tpu.memory_space<vmem>>, vector<8x4xf32>
    %c0_1 = arith.constant 0 : index
    %c0_2 = arith.constant 0 : index
    %1 = vector.load %arg2[%c0_1, %c0_2] : memref<4x128xf32, #tpu.memory_space<vmem>>, vector<4x128xf32>
    %cst = arith.constant dense<0.000000e+00> : vector<8x128xf32>
    %2 = tpu.matmul %0, %1, %cst {dimension_numbers = #tpu.dot_dimension_numbers<[1], [0], [0], [1], [0, 0, 1, 1], [], []>} : vector<8x4xf32>, vector<4x128xf32>, vector<8x128xf32> -> vector<8x128xf32>
    %c0_3 = arith.constant 0 : index
    %c0_4 = arith.constant 0 : index
    %3 = vector.load %arg3[%c0_3, %c0_4] : memref<1x128xf32, #tpu.memory_space<vmem>>, vector<1x128xf32>
    %4 = vector.broadcast %3 : vector<1x128xf32> to vector<8x128xf32>
    %5 = arith.addf %2, %4 : vector<8x128xf32>
    %cst_5 = arith.constant 0.000000e+00 : f32
    %6 = vector.broadcast %cst_5 : f32 to vector<8x128xf32>
    %7 = arith.maximumf %5, %6 : vector<8x128xf32>
    %c0_6 = arith.constant 0 : index
    %c0_7 = arith.constant 0 : index
    %8 = vector.load %arg4[%c0_6, %c0_7] : memref<128x8xf32, #tpu.memory_space<vmem>>, vector<128x8xf32>
    %cst_8 = arith.constant dense<0.000000e+00> : vector<8x8xf32>
    %9 = tpu.matmul %7, %8, %cst_8 {dimension_numbers = #tpu.dot_dimension_numbers<[1], [0], [0], [1], [0, 0, 1, 1], [], []>} : vector<8x128xf32>, vector<128x8xf32>, vector<8x8xf32> -> vector<8x8xf32>
    %c0_9 = arith.constant 0 : index
    %c0_10 = arith.constant 0 : index
    %10 = vector.load %arg5[%c0_9, %c0_10] : memref<1x8xf32, #tpu.memory_space<vmem>>, vector<1x8xf32>
    %11 = vector.broadcast %10 : vector<1x8xf32> to vector<8x8xf32>
    %12 = arith.addf %9, %11 : vector<8x8xf32>
    %13 = vector.extract_strided_slice %12 {offsets = [0, 0], sizes = [8, 1], strides = [1, 1]} : vector<8x8xf32> to vector<8x1xf32>
    %14 = vector.extract_strided_slice %12 {offsets = [0, 1], sizes = [8, 1], strides = [1, 1]} : vector<8x8xf32> to vector<8x1xf32>
    %15 = arith.subf %13, %14 : vector<8x1xf32>
    %16 = arith.negf %15 : vector<8x1xf32>
    %17 = math.exp %16 : vector<8x1xf32>
    %cst_11 = arith.constant 1.000000e+00 : f32
    %18 = vector.broadcast %cst_11 : f32 to vector<8x1xf32>
    %19 = arith.addf %18, %17 : vector<8x1xf32>
    %20 = arith.divf %18, %19 : vector<8x1xf32>
    %21 = arith.subf %14, %13 : vector<8x1xf32>
    %22 = arith.negf %21 : vector<8x1xf32>
    %23 = math.exp %22 : vector<8x1xf32>
    %cst_12 = arith.constant 1.000000e+00 : f32
    %24 = vector.broadcast %cst_12 : f32 to vector<8x1xf32>
    %25 = arith.addf %24, %23 : vector<8x1xf32>
    %26 = arith.divf %24, %25 : vector<8x1xf32>
    %c0_13 = arith.constant 0 : index
    %c0_14 = arith.constant 0 : index
    %27 = vector.load %arg6[%c0_13, %c0_14] : memref<8x8xf32, #tpu.memory_space<vmem>>, vector<8x8xf32>
    tpu.vector_store %arg6[%c0_13, %c0_14], %12 {strides = array<i32>} : memref<8x8xf32, #tpu.memory_space<vmem>>, vector<8x8xf32>,
    %c0_15 = arith.constant 0 : index
    %c0_16 = arith.constant 0 : index
    %28 = vector.load %arg6[%c0_15, %c0_16] : memref<8x8xf32, #tpu.memory_space<vmem>>, vector<8x1xf32>
    tpu.vector_store %arg6[%c0_15, %c0_16], %20 {strides = array<i32>} : memref<8x8xf32, #tpu.memory_space<vmem>>, vector<8x1xf32>,
    %c0_17 = arith.constant 0 : index
    %c1 = arith.constant 1 : index
    %29 = vector.load %arg6[%c0_17, %c1] : memref<8x8xf32, #tpu.memory_space<vmem>>, vector<8x1xf32>
    tpu.vector_store %arg6[%c0_17, %c1], %26 {strides = array<i32>} : memref<8x8xf32, #tpu.memory_space<vmem>>, vector<8x1xf32>,
    return
  }
  func.func @transform_0(%arg0: i32) -> (i32, i32) {
    %c0_i32 = arith.constant 0 : i32
    %c0_i32_0 = arith.constant 0 : i32
    return %arg0, %c0_i32 : i32, i32
  }
  func.func @transform_1(%arg0: i32) -> (i32, i32) {
    %c0_i32 = arith.constant 0 : i32
    %c0_i32_0 = arith.constant 0 : i32
    %c0_i32_1 = arith.constant 0 : i32
    return %c0_i32, %c0_i32_0 : i32, i32
  }
  func.func @transform_2(%arg0: i32) -> (i32, i32) {
    %c0_i32 = arith.constant 0 : i32
    %c0_i32_0 = arith.constant 0 : i32
    %c0_i32_1 = arith.constant 0 : i32
    return %c0_i32, %c0_i32_0 : i32, i32
  }
  func.func @transform_3(%arg0: i32) -> (i32, i32) {
    %c0_i32 = arith.constant 0 : i32
    %c0_i32_0 = arith.constant 0 : i32
    %c0_i32_1 = arith.constant 0 : i32
    return %c0_i32, %c0_i32_0 : i32, i32
  }
  func.func @transform_4(%arg0: i32) -> (i32, i32) {
    %c0_i32 = arith.constant 0 : i32
    %c0_i32_0 = arith.constant 0 : i32
    %c0_i32_1 = arith.constant 0 : i32
    return %c0_i32, %c0_i32_0 : i32, i32
  }
  func.func @transform_5(%arg0: i32) -> (i32, i32) {
    %c0_i32 = arith.constant 0 : i32
    %c0_i32_0 = arith.constant 0 : i32
    return %arg0, %c0_i32 : i32, i32
  }
}

</mosaic_0001>

<bundles_post_ra>
// kernel: tpu_custom_call.1
= control target key start
LH: loop header
LB: loop body
LE: loop exit
PB: predicated region body
PF: predicated region fallthrough
CT: control target
= control target key end

     0   :  { %vm31_vm0 = vcmask 1043456   ;;  %vm27_vm1 = vcmask 31744   ;;  %s304_s0 = inlined_call_operand.vmem [shape: f32[8,4], index: 0, kind: input, shape index: {}]   ;;  %s305_s1 = inlined_call_operand.vmem [shape: f32[4,128], index: 1, kind: input, shape index: {}]   ;;  %s306_s2 = inlined_call_operand.vmem [shape: f32[1,128], index: 2, kind: input, shape index: {}]   ;;  %s307_s3 = inlined_call_operand.vmem [shape: f32[128,8], index: 3, kind: input, shape index: {}]   ;;  %s308_s4 = inlined_call_operand.vmem [shape: f32[1,8], index: 4, kind: input, shape index: {}]   ;;  %s309_s5 = inlined_call_operand.hbm [shape: f32[8,8], index: 5, kind: output, shape index: {}]  }
   0x1   :  { %v22_v0 = vld [vmem:[%s305_s1] sm:$0xf]  ;;  %v71_v2 = vld [vmem:[%s307_s3 + $0x78] sm:$0xff]  ;;  %v70_v3 = vld [vmem:[%s307_s3 + $0x70] sm:$0xff] }
   0x2   :  { %v21_v1 = vld [vmem:[%s304_s0] sm:$0xff]  ;;  %165 = vmatpush.msk.msra.mxu0 %vm31_vm0, %v22_v0  ;;  %76 = vmatpush.msra.mxu1 %v71_v2  ;;  %v69_v4 = vld [vmem:[%s307_s3 + $0x68] sm:$0xff]  ;;  %v67_v6 = vld [vmem:[%s307_s3 + $0x58] sm:$0xff] }
   0x3   :  { %166 = vmatmul.msk.f32.vlgmr.msra.gmra.mxu0 %vm27_vm1, %v21_v1  ;;  %v68_v5 = vld [vmem:[%s307_s3 + $0x60] sm:$0xff] }
   0x4   :  { %77 = vmatpush.msra.mxu1 %v70_v3 }
   0x6   :  { %78 = vmatpush.msra.mxu1 %v69_v4 }
   0x7   :  { %10 = vsyncpa [#allocation3], 0  ;;  %v66_v7 = vld [vmem:[%s307_s3 + $0x50] sm:$0xff]  ;;  %v65_v8 = vld [vmem:[%s307_s3 + $0x48] sm:$0xff]  ;;  %vm143_vm2 = vcmask 64512   ;;  %s208_s29 = smov 127  }
   0x8   :  { %79 = vmatpush.msra.mxu1 %v68_v5  ;;  %v64_v9 = vld [vmem:[%s307_s3 + $0x40] sm:$0xff]  ;;  %v63_v10 = vld [vmem:[%s307_s3 + $0x38] sm:$0xff]  ;;  %v62_v11 = vld [vmem:[%s307_s3 + $0x30] sm:$0xff]  ;;  %vm145_vm6 = vcmask 7168   ;;  %s156_s7 = sshll.u32 %s309_s5, 4  ;;  %vm147_vm11 = vcmask 15368   ;;  %s157_s7 = int_to_ptr.hbm [resolvable:$true] %s156_s7 }
   0x9   :  { %v61_v12 = vld [vmem:[%s307_s3 + $0x28] sm:$0xff]  ;;  %v60_v13 = vld [vmem:[%s307_s3 + $0x20] sm:$0xff]  ;;  %v59_v14 = vld [vmem:[%s307_s3 + $0x18] sm:$0xff] }
   0xa   :  { %80 = vmatpush.msra.mxu1 %v67_v6  ;;  %v58_v15 = vld [vmem:[%s307_s3 + $0x10] sm:$0xff]  ;;  %v57_v16 = vld [vmem:[%s307_s3 + $0x8] sm:$0xff]  ;;  %v56_v17 = vld [vmem:[%s307_s3] sm:$0xff]  ;;  %s209_s3 = smov 1  }
   0xb   :  { %v172_v18 = vld [vmem:[%s306_s2] ss:$0 sm:$0xff]  ;;  %s210_s2 = smov [#allocation2]  }
   0xc   :  { %81 = vmatpush.msra.mxu1 %v66_v7  ;;  %v173_v22 = vld [vmem:[%s308_s4] ss:$0 sm:$0xff]  ;;  %s154_s4 = sshll.u32 %s210_s2, 4  ;;  %s155_s4 = int_to_ptr.vmem [resolvable:$true] %s154_s4 }
   0xe   :  { %82 = vmatpush.msra.mxu1 %v65_v8 }
  0x10   :  { %83 = vmatpush.msra.mxu1 %v64_v9 }
  0x12   :  { %84 = vmatpush.msra.mxu1 %v63_v10 }
  0x14   :  { %85 = vmatpush.msra.mxu1 %v62_v11 }
  0x16   :  { %86 = vmatpush.msra.mxu1 %v61_v12 }
  0x18   :  { %87 = vmatpush.msra.mxu1 %v60_v13 }
  0x1a   :  { %88 = vmatpush.msra.mxu1 %v59_v14 }
  0x1c   :  { %89 = vmatpush.msra.mxu1 %v58_v15 }
  0x1e   :  { %90 = vmatpush.msra.mxu1 %v57_v16 }
  0x20   :  { %91 = vmatpush.msra.mxu1 %v56_v17 }
  0x80   :  { %v52_v19 = vpop.f32.mrf.mxu0 }
  0x81   :  { %v53_v20 = vadd.f32 %v172_v18, %v52_v19 }
  0x83   :  { %v55_v21 = vmax.f32 %v53_v20, 0.0 }
  0x85   :  { %92 = vmatmul.f32.vlgmr.msra.gmra.mxu1 %v55_v21 }
 0x102   :  { %v93_v23 = vpop.f32.mrf.mxu1 }
 0x103   :  { %v94_v24 = vadd.f32 %v173_v22, %v93_v23 }
 0x105   :  { %97 = vrot.lane.b32.xlu0 %v94_v24, %s208_s29  ;;  %144 = vst.msk [vmem:[#allocation2] sm:$0xff] %vm143_vm2, %v94_v24 }
 0x10d   :  { %120 = vrot.lane.b32.xlu0 %v94_v24, %s209_s3 }
 0x177   :  { %v98_v25 = vpop.permute.xlu0 %97 }
 0x178   :  { %v100_v26 = vsub.f32 %v94_v24, %v98_v25 }
 0x17a   :  { %v167_v27 = vmul.f32 -1.442695, %v100_v26 }
 0x17c   :  { %174 = vpow2.f32 %v167_v27 }
 0x17f   :  { %v121_v28 = vpop.permute.xlu0 %120 }
 0x180   :  { %v123_v29 = vsub.f32 %v94_v24, %v121_v28 }
 0x182   :  { %v175_v30 = vpop.eup %174  ;;  %v168_v31 = vmul.f32 -1.442695, %v123_v29 }
 0x183   :  { %v104_v32 = vadd.f32 1.0, %v175_v30 }
 0x184   :  { %176 = vpow2.f32 %v168_v31 }
 0x185   :  { %178 = vrcp.f32 %v104_v32  ;;  %v116_v38 = vand.u32 2147483648, %v104_v32  ;;  %v114_v40 = vand.u32 2147483647, %v104_v32  ;;  %vm110_vm4 = vweird.f32 %v104_v32 }
 0x187   :  { %v117_v43 = vor.u32 1.1754944e-38, %v116_v38  ;;  %vm115_vm7 = vcmp.eq.f32.partialorder %v114_v40, 8.507059e+37 }
 0x18a   :  { %v177_v33 = vpop.eup %176 }
 0x18b   :  { %v179_v34 = vpop.eup %178  ;;  %v127_v35 = vadd.f32 1.0, %v177_v33 }
 0x18c   :  { %v106_v36 = vmul.f32 %v179_v34, %v104_v32  ;;  %vm111_vm3 = vweird.f32 %v179_v34 }
 0x18d   :  { %180 = vrcp.f32 %v127_v35  ;;  %vm112_vm5 = vmor %vm110_vm4, %vm111_vm3  ;;  %v139_v48 = vand.u32 2147483648, %v127_v35  ;;  %v137_v50 = vand.u32 2147483647, %v127_v35  ;;  %vm133_vm9 = vweird.f32 %v127_v35 }
 0x18e   :  { %v107_v37 = vsub.f32 1.0, %v106_v36 }
 0x18f   :  { %v140_v52 = vor.u32 1.1754944e-38, %v139_v48  ;;  %vm138_vm12 = vcmp.eq.f32.partialorder %v137_v50, 8.507059e+37 }
 0x190   :  { %v108_v39 = vmul.f32 %v179_v34, %v107_v37 }
 0x192   :  { %v109_v41 = vadd.f32 %v179_v34, %v108_v39 }
 0x193   :  { %v181_v42 = vpop.eup %180 }
 0x194   :  { %v129_v44 = vmul.f32 %v181_v42, %v127_v35  ;;  %v113_v45 = vsel %vm112_vm5, %v179_v34, %v109_v41  ;;  %vm134_vm8 = vweird.f32 %v181_v42 }
 0x195   :  { %v118_v46 = vsel %vm115_vm7, %v117_v43, %v113_v45  ;;  %vm135_vm10 = vmor %vm133_vm9, %vm134_vm8 }
 0x196   :  { %v130_v47 = vsub.f32 1.0, %v129_v44  ;;  %146 = vst.msk [vmem:[#allocation2] sm:$0xff] %vm145_vm6, %v118_v46 }
 0x198   :  { %v131_v49 = vmul.f32 %v181_v42, %v130_v47 }
 0x19a   :  { %v132_v51 = vadd.f32 %v181_v42, %v131_v49 }
 0x19c   :  { %v136_v53 = vsel %vm135_vm10, %v181_v42, %v132_v51 }
 0x19d   :  { %v141_v54 = vsel %vm138_vm12, %v140_v52, %v136_v53 }
 0x19e   :  { %148 = vst.msk [vmem:[#allocation2] sm:$0xff] %vm147_vm11, %v141_v54 }
 0x19f   :  { %159 = dma.vmem_to_hbm [thread:$0]  %s155_s4, 128, %s157_s7, [#allocation3]  }
 0x1a0   :  { %206 = dma.done.wait [#allocation3], 128  }
 0x1a1   :  { %207 = vsyncadd [#allocation3], 4294967168 }
 0x1a2   :  { %164 = vsyncpa [#allocation3], 1 }

</bundles_post_ra>
